<compile_context>
chip_gen: v7x
topology: tpu7x:2x2x1
jax: 0.10.0
libtpu: 0.0.40
codegen_flags: <defaults>
</compile_context>

<pallas_src>
import functools

import jax
import jax.numpy as jnp
from jax.experimental import pallas as pl
from jax.experimental.pallas import tpu as pltpu

EPS = 1e-5  # torch.nn.LayerNorm default


def _round_up(x, m):
    return (x + m - 1) // m * m


def _vmem_budget_bytes():
    """Usable VMEM budget (~75% of physical), with a safe 64 MiB-capacity fallback."""
    cap = 64 << 20
    try:
        info_fn = getattr(pltpu, "get_tpu_info", None)
        if info_fn is not None:
            cap = int(getattr(info_fn(), "vmem_capacity_bytes", cap))
    except Exception:
        cap = 64 << 20
    return max(cap * 3 // 4, 32 << 20)


def _pick_tile_rows(M, tile_m, vmem_fit):
    """Row-tile size: multiple of 8, <= M, aiming for >= ~4 grid steps (>= 2 per TC on v7x)."""
    if M <= 16:
        tm = M                                   # single tiny block (full dim is always legal)
    else:
        tm = _round_up(pl.cdiv(M, 4), 8)         # >= ~4 grid steps for pipelining / megacore
        tm = min(tm, max(8, (tile_m // 8) * 8))
        tm = min(tm, (M // 8) * 8)
        tm = max(tm, 8)
    while tm > 8 and not vmem_fit(tm):           # shrink to fit the per-chip VMEM budget
        tm = max(8, ((tm // 2) // 8) * 8)
    return tm


def _patch_embed_kernel(x_ref, w_ref, b_ref, g2_ref, b2_ref, o_ref):
    """One row-tile of patches: LN(patch_dim) -> Linear (MXU, f32 acc) -> LN(embed_dim).

    gamma1/beta1 are pre-folded into w_ref/b_ref, so LN1 here is the un-affine normalize.
    Rows are fully independent, so Pallas' partial-block handling of the ragged tail is safe
    (stale tail rows are never written back).
    """
    x = x_ref[...].astype(jnp.float32)                         # (TM, D)

    # LayerNorm over patch_dim (biased variance, eps=1e-5, like torch).
    mu = jnp.mean(x, axis=-1, keepdims=True)
    var = jnp.mean(jnp.square(x - mu), axis=-1, keepdims=True)
    xhat = (x - mu) * jax.lax.rsqrt(var + EPS)

    # Linear with LN1-affine folded in: (TM, D) @ (D, E) + (1, E).
    # Weight already cast to the matmul dtype (bf16 by default) -> native MXU, f32 acc.
    y = jnp.dot(xhat.astype(w_ref.dtype), w_ref[...],
                preferred_element_type=jnp.float32) + b_ref[...]

    # LayerNorm over embed_dim (no padding -> no masking needed).
    mu2 = jnp.mean(y, axis=-1, keepdims=True)
    var2 = jnp.mean(jnp.square(y - mu2), axis=-1, keepdims=True)
    yn = (y - mu2) * jax.lax.rsqrt(var2 + EPS)
    o_ref[...] = (yn * g2_ref[...] + b2_ref[...]).astype(o_ref.dtype)


@functools.partial(jax.jit, static_argnames=("patch_size", "permute", "tile_m",
                                              "matmul_dtype", "out_dtype"))
def patch_embed_forward(x, params, *, patch_size, permute=True, tile_m=1024,
                        matmul_dtype=jnp.bfloat16, out_dtype=jnp.bfloat16):
    """x: (B, C, H, W).  Returns (L, B, E) if permute else (B, L, E).

    Matches PyTorch PatchEmbed with patch_dir='row-major' (nn.Unfold feature order (c,p1,p2)).
    """
    g1, b1, w, b, g2, b2 = params                               # (D,),(D,),(D,E),(E,),(E,),(E,)
    B, C, H, W = x.shape
    P = patch_size
    Hp, Wp = H // P, W // P
    L = Hp * Wp
    D = C * P * P
    E = w.shape[1]

    # Patchify (single fused XLA transpose pass).  For permute=True produce (L, B, D) directly
    # so the kernel's flat (L*B, E) output is already the final (L, B, E) layout — no output
    # permute pass.  (See TODO(synk) at top about folding this pass into the kernel.)
    xr = x.reshape(B, C, Hp, P, Wp, P)
    if permute:
        patches = jnp.transpose(xr, (2, 4, 0, 1, 3, 5)).reshape(L * B, D)
    else:
        patches = jnp.transpose(xr, (0, 2, 4, 1, 3, 5)).reshape(B * L, D)
    M = patches.shape[0]

    # Fold LN1's affine into the linear layer (exact in f32): W' = diag(g1) @ W, b' = b1 @ W + b.
    w_eff = (g1[:, None].astype(jnp.float32) * w.astype(jnp.float32)).astype(matmul_dtype)
    b_eff = (jnp.dot(b1.astype(jnp.float32), w.astype(jnp.float32))
             + b.astype(jnp.float32)).reshape(1, E)
    g2r = g2.reshape(1, E).astype(jnp.float32)
    b2r = b2.reshape(1, E).astype(jnp.float32)

    # VMEM working-set estimate (double-buffered input/output tiles and invariant weight,
    # small params, slack) and per-chip budget.
    w_itemsize = jnp.dtype(matmul_dtype).itemsize
    out_itemsize = jnp.dtype(out_dtype).itemsize
    budget = _vmem_budget_bytes()

    def vmem_est(tm_):
        return (2 * tm_ * D * 4                 # input tile (f32)
                + 2 * tm_ * E * out_itemsize    # output tile
                + 2 * D * E * w_itemsize        # weight (constant index map, still 2 buffers)
                + 2 * 3 * E * 4                 # bias / gamma2 / beta2
                + (2 << 20))                    # compiler scratch slack

    tm = _pick_tile_rows(M, tile_m, lambda t: vmem_est(t) <= budget)
    grid = pl.cdiv(M, tm)                       # ragged tail handled by partial blocks
    vmem_limit = int(min(budget, max(vmem_est(tm) + (4 << 20), 32 << 20)))

    out2d = pl.pallas_call(
        _patch_embed_kernel,
        out_shape=jax.ShapeDtypeStruct((M, E), out_dtype),
        grid_spec=pltpu.PrefetchScalarGridSpec(
            num_scalar_prefetch=0,
            grid=(grid,),
            in_specs=[
                pl.BlockSpec((tm, D), lambda i: (i, 0)),    # patch rows tile
                pl.BlockSpec((D, E), lambda i: (0, 0)),     # fused weight (grid-invariant)
                pl.BlockSpec((1, E), lambda i: (0, 0)),     # fused bias
                pl.BlockSpec((1, E), lambda i: (0, 0)),     # gamma2
                pl.BlockSpec((1, E), lambda i: (0, 0)),     # beta2
            ],
            out_specs=pl.BlockSpec((tm, E), lambda i: (i, 0)),
        ),
        compiler_params=pltpu.CompilerParams(
            dimension_semantics=("parallel",),
            vmem_limit_bytes=vmem_limit,
        ),
    )(patches, w_eff, b_eff, g2r, b2r)

    return out2d.reshape(L, B, E) if permute else out2d.reshape(B, L, E)


def reference_forward(x, params, *, patch_size, permute=True, matmul_dtype=jnp.float32):
    """Plain-JAX reference (mirrors the PyTorch module; optional bf16 matmul for comparison)."""
    g1, b1, w, b, g2, b2 = params
    B, C, H, W = x.shape
    P = patch_size
    Hp, Wp = H // P, W // P
    xr = x.reshape(B, C, Hp, P, Wp, P)
    p = jnp.transpose(xr, (0, 2, 4, 1, 3, 5)).reshape(B, Hp * Wp, C * P * P)
    p = p.astype(jnp.float32)
    mu = p.mean(-1, keepdims=True)
    var = ((p - mu) ** 2).mean(-1, keepdims=True)
    p = (p - mu) * jax.lax.rsqrt(var + EPS) * g1 + b1
    y = jnp.dot(p.astype(matmul_dtype), w.astype(matmul_dtype),
                preferred_element_type=jnp.float32) + b
    mu2 = y.mean(-1, keepdims=True)
    var2 = ((y - mu2) ** 2).mean(-1, keepdims=True)
    y = (y - mu2) * jax.lax.rsqrt(var2 + EPS) * g2 + b2
    if permute:
        y = jnp.transpose(y, (1, 0, 2))
    return y


def _make_params(key, D, E):
    k = jax.random.split(key, 6)
    gamma1 = 1.0 + 0.1 * jax.random.normal(k[0], (D,), jnp.float32)
    beta1 = 0.05 * jax.random.normal(k[1], (D,), jnp.float32)
    w = jax.random.normal(k[2], (D, E), jnp.float32) / jnp.sqrt(D)
    b = 0.02 * jax.random.normal(k[3], (E,), jnp.float32)
    gamma2 = 1.0 + 0.1 * jax.random.normal(k[4], (E,), jnp.float32)
    beta2 = 0.05 * jax.random.normal(k[5], (E,), jnp.float32)
    return (gamma1, beta1, w, b, gamma2, beta2)


if __name__ == "__main__":
    key = jax.random.PRNGKey(0)
    k1, k2, k3, k4 = jax.random.split(key, 4)

    # --- Test 1: default production path (bf16 MXU matmul, bf16 output), permute=True ---
    B, C, H, W, P, EMB = 2, 4, 16, 16, 4, 32
    D = C * P * P
    L = (H // P) * (W // P)
    x = jax.random.normal(k1, (B, C, H, W), dtype=jnp.float32)
    params = _make_params(k2, D, EMB)

    out = jax.block_until_ready(patch_embed_forward(x, params, patch_size=P, permute=True))
    assert out.shape == (L, B, EMB), out.shape
    assert out.dtype == jnp.bfloat16, out.dtype
    out32 = out.astype(jnp.float32)
    ref_bf16 = reference_forward(x, params, patch_size=P, permute=True,
                                 matmul_dtype=jnp.bfloat16)
    assert jnp.allclose(out32, ref_bf16, atol=1e-1, rtol=1e-1), \
        float(jnp.max(jnp.abs(out32 - ref_bf16)))
    ref_f32 = reference_forward(x, params, patch_size=P, permute=True)
    assert jnp.allclose(out32, ref_f32, atol=1.5e-1, rtol=1.5e-1), \
        float(jnp.max(jnp.abs(out32 - ref_f32)))

    # --- Test 2: exact-parity path (f32 matmul, f32 output), permute=False layout ---
    out_f32 = jax.block_until_ready(
        patch_embed_forward(x, params, patch_size=P, permute=False,
                            matmul_dtype=jnp.float32, out_dtype=jnp.float32))
    ref_nb = reference_forward(x, params, patch_size=P, permute=False)
    assert out_f32.shape == (B, L, EMB), out_f32.shape
    assert out_f32.dtype == jnp.float32
    assert jnp.allclose(out_f32, ref_nb, atol=2e-4, rtol=2e-4), \
        float(jnp.max(jnp.abs(out_f32 - ref_nb)))

    # --- Test 3: ragged rows (grid tail) + non-128-multiple D (48) and E (40) ---
    B2, C2, H2, W2, P2, E2 = 2, 3, 28, 28, 4, 40
    D2 = C2 * P2 * P2
    L2 = (H2 // P2) * (W2 // P2)                  # 49 patches -> M = 98, tile=32 -> tail of 2
    x2 = jax.random.normal(k3, (B2, C2, H2, W2), dtype=jnp.float32)
    params2 = _make_params(k4, D2, E2)
    out2 = jax.block_until_ready(
        patch_embed_forward(x2, params2, patch_size=P2, permute=True, tile_m=32,
                            matmul_dtype=jnp.float32, out_dtype=jnp.float32))
    ref2 = reference_forward(x2, params2, patch_size=P2, permute=True)
    assert out2.shape == (L2, B2, E2), out2.shape
    assert jnp.allclose(out2, ref2, atol=2e-4, rtol=2e-4), \
        float(jnp.max(jnp.abs(out2 - ref2)))

    print("KERNEL_OK")
</pallas_src>

<mosaic_0001>
module attributes {stable_mosaic.version = 11 : i64} {
  func.func @_patch_embed_kernel(%arg0: i32, %arg1: memref<8x64xf32, #tpu.memory_space<vmem>>, %arg2: memref<64x32xbf16, #tpu.memory_space<vmem>>, %arg3: memref<1x32xf32, #tpu.memory_space<vmem>>, %arg4: memref<1x32xf32, #tpu.memory_space<vmem>>, %arg5: memref<1x32xf32, #tpu.memory_space<vmem>>, %arg6: memref<8x32xbf16, #tpu.memory_space<vmem>>) attributes {dimension_semantics = [#tpu.dimension_semantics<parallel>], iteration_bounds = array<i64: 4>, scalar_prefetch = 0 : i64, scratch_operands = 0 : i64, tpu.core_type = #tpu.core_type<tc>, window_params = [{transform_indices = @transform_0, window_bounds = array<i64: 8, 64>}, {pipeline_mode = #tpu.pipeline_mode<synchronous>, transform_indices = @transform_1, window_bounds = array<i64: 64, 32>}, {pipeline_mode = #tpu.pipeline_mode<synchronous>, transform_indices = @transform_2, window_bounds = array<i64: 1, 32>}, {pipeline_mode = #tpu.pipeline_mode<synchronous>, transform_indices = @transform_3, window_bounds = array<i64: 1, 32>}, {pipeline_mode = #tpu.pipeline_mode<synchronous>, transform_indices = @transform_4, window_bounds = array<i64: 1, 32>}, {transform_indices = @transform_5, window_bounds = array<i64: 8, 32>}]} {
    %c0 = arith.constant 0 : index
    %c0_0 = arith.constant 0 : index
    %0 = vector.load %arg1[%c0, %c0_0] : memref<8x64xf32, #tpu.memory_space<vmem>>, vector<8x64xf32>
    %cst = arith.constant dense<0.000000e+00> : vector<8xf32>
    %1 = vector.multi_reduction <add>, %0, %cst [1] : vector<8x64xf32> to vector<8xf32>
    %2 = vector.shape_cast %1 : vector<8xf32> to vector<8x1xf32>
    %cst_1 = arith.constant 6.400000e+01 : f32
    %3 = vector.broadcast %cst_1 : f32 to vector<8x1xf32>
    %4 = arith.divf %2, %3 : vector<8x1xf32>
    %5 = vector.broadcast %4 : vector<8x1xf32> to vector<8x64xf32>
    %6 = arith.subf %0, %5 : vector<8x64xf32>
    %7 = arith.mulf %6, %6 : vector<8x64xf32>
    %cst_2 = arith.constant dense<0.000000e+00> : vector<8xf32>
    %8 = vector.multi_reduction <add>, %7, %cst_2 [1] : vector<8x64xf32> to vector<8xf32>
    %9 = vector.shape_cast %8 : vector<8xf32> to vector<8x1xf32>
    %cst_3 = arith.constant 6.400000e+01 : f32
    %10 = vector.broadcast %cst_3 : f32 to vector<8x1xf32>
    %11 = arith.divf %9, %10 : vector<8x1xf32>
    %12 = vector.broadcast %4 : vector<8x1xf32> to vector<8x64xf32>
    %13 = arith.subf %0, %12 : vector<8x64xf32>
    %cst_4 = arith.constant 9.99999974E-6 : f32
    %14 = vector.broadcast %cst_4 : f32 to vector<8x1xf32>
    %15 = arith.addf %11, %14 : vector<8x1xf32>
    %16 = math.rsqrt %15 : vector<8x1xf32>
    %17 = vector.broadcast %16 : vector<8x1xf32> to vector<8x64xf32>
    %18 = arith.mulf %13, %17 : vector<8x64xf32>
    %19 = arith.truncf %18 : vector<8x64xf32> to vector<8x64xbf16>
    %c0_5 = arith.constant 0 : index
    %c0_6 = arith.constant 0 : index
    %20 = vector.load %arg2[%c0_5, %c0_6] : memref<64x32xbf16, #tpu.memory_space<vmem>>, vector<64x32xbf16>
    %cst_7 = arith.constant dense<0.000000e+00> : vector<8x32xf32>
    %21 = tpu.matmul %19, %20, %cst_7 {dimension_numbers = #tpu.dot_dimension_numbers<[1], [0], [0], [1], [0, 0, 1, 1], [], []>} : vector<8x64xbf16>, vector<64x32xbf16>, vector<8x32xf32> -> vector<8x32xf32>
    %c0_8 = arith.constant 0 : index
    %c0_9 = arith.constant 0 : index
    %22 = vector.load %arg3[%c0_8, %c0_9] : memref<1x32xf32, #tpu.memory_space<vmem>>, vector<1x32xf32>
    %23 = vector.broadcast %22 : vector<1x32xf32> to vector<8x32xf32>
    %24 = arith.addf %21, %23 : vector<8x32xf32>
    %cst_10 = arith.constant dense<0.000000e+00> : vector<8xf32>
    %25 = vector.multi_reduction <add>, %24, %cst_10 [1] : vector<8x32xf32> to vector<8xf32>
    %26 = vector.shape_cast %25 : vector<8xf32> to vector<8x1xf32>
    %cst_11 = arith.constant 3.200000e+01 : f32
    %27 = vector.broadcast %cst_11 : f32 to vector<8x1xf32>
    %28 = arith.divf %26, %27 : vector<8x1xf32>
    %29 = vector.broadcast %28 : vector<8x1xf32> to vector<8x32xf32>
    %30 = arith.subf %24, %29 : vector<8x32xf32>
    %31 = arith.mulf %30, %30 : vector<8x32xf32>
    %cst_12 = arith.constant dense<0.000000e+00> : vector<8xf32>
    %32 = vector.multi_reduction <add>, %31, %cst_12 [1] : vector<8x32xf32> to vector<8xf32>
    %33 = vector.shape_cast %32 : vector<8xf32> to vector<8x1xf32>
    %cst_13 = arith.constant 3.200000e+01 : f32
    %34 = vector.broadcast %cst_13 : f32 to vector<8x1xf32>
    %35 = arith.divf %33, %34 : vector<8x1xf32>
    %36 = vector.broadcast %28 : vector<8x1xf32> to vector<8x32xf32>
    %37 = arith.subf %24, %36 : vector<8x32xf32>
    %cst_14 = arith.constant 9.99999974E-6 : f32
    %38 = vector.broadcast %cst_14 : f32 to vector<8x1xf32>
    %39 = arith.addf %35, %38 : vector<8x1xf32>
    %40 = math.rsqrt %39 : vector<8x1xf32>
    %41 = vector.broadcast %40 : vector<8x1xf32> to vector<8x32xf32>
    %42 = arith.mulf %37, %41 : vector<8x32xf32>
    %c0_15 = arith.constant 0 : index
    %c0_16 = arith.constant 0 : index
    %43 = vector.load %arg4[%c0_15, %c0_16] : memref<1x32xf32, #tpu.memory_space<vmem>>, vector<1x32xf32>
    %44 = vector.broadcast %43 : vector<1x32xf32> to vector<8x32xf32>
    %45 = arith.mulf %42, %44 : vector<8x32xf32>
    %c0_17 = arith.constant 0 : index
    %c0_18 = arith.constant 0 : index
    %46 = vector.load %arg5[%c0_17, %c0_18] : memref<1x32xf32, #tpu.memory_space<vmem>>, vector<1x32xf32>
    %47 = vector.broadcast %46 : vector<1x32xf32> to vector<8x32xf32>
    %48 = arith.addf %45, %47 : vector<8x32xf32>
    %49 = arith.truncf %48 : vector<8x32xf32> to vector<8x32xbf16>
    %c0_19 = arith.constant 0 : index
    %c0_20 = arith.constant 0 : index
    %50 = vector.load %arg6[%c0_19, %c0_20] : memref<8x32xbf16, #tpu.memory_space<vmem>>, vector<8x32xbf16>
    tpu.vector_store %arg6[%c0_19, %c0_20], %49 {strides = array<i32>} : memref<8x32xbf16, #tpu.memory_space<vmem>>, vector<8x32xbf16>,
    return
  }
  func.func @transform_0(%arg0: i32) -> (i32, i32) {
    %c0_i32 = arith.constant 0 : i32
    %c0_i32_0 = arith.constant 0 : i32
    return %arg0, %c0_i32 : i32, i32
  }
  func.func @transform_1(%arg0: i32) -> (i32, i32) {
    %c0_i32 = arith.constant 0 : i32
    %c0_i32_0 = arith.constant 0 : i32
    %c0_i32_1 = arith.constant 0 : i32
    return %c0_i32, %c0_i32_0 : i32, i32
  }
  func.func @transform_2(%arg0: i32) -> (i32, i32) {
    %c0_i32 = arith.constant 0 : i32
    %c0_i32_0 = arith.constant 0 : i32
    %c0_i32_1 = arith.constant 0 : i32
    return %c0_i32, %c0_i32_0 : i32, i32
  }
  func.func @transform_3(%arg0: i32) -> (i32, i32) {
    %c0_i32 = arith.constant 0 : i32
    %c0_i32_0 = arith.constant 0 : i32
    %c0_i32_1 = arith.constant 0 : i32
    return %c0_i32, %c0_i32_0 : i32, i32
  }
  func.func @transform_4(%arg0: i32) -> (i32, i32) {
    %c0_i32 = arith.constant 0 : i32
    %c0_i32_0 = arith.constant 0 : i32
    %c0_i32_1 = arith.constant 0 : i32
    return %c0_i32, %c0_i32_0 : i32, i32
  }
  func.func @transform_5(%arg0: i32) -> (i32, i32) {
    %c0_i32 = arith.constant 0 : i32
    %c0_i32_0 = arith.constant 0 : i32
    return %arg0, %c0_i32 : i32, i32
  }
}

</mosaic_0001>

<bundles_post_ra>
// kernel: patch_embed_forward.1
= control target key start
LH: loop header
LB: loop body
LE: loop exit
PB: predicated region body
PF: predicated region fallthrough
CT: control target
= control target key end

     0   :  { %10 = vsyncpa [#allocation3], 0  ;;  %s732_s0 = inlined_call_operand.vmem [shape: f32[32,64], index: 0, kind: input, shape index: {}]   ;;  %s733_s1 = inlined_call_operand.vmem [shape: bf16[64,32], index: 1, kind: input, shape index: {}]   ;;  %s734_s2 = inlined_call_operand.vmem [shape: f32[1,32], index: 2, kind: input, shape index: {}]   ;;  %s735_s3 = inlined_call_operand.vmem [shape: f32[1,32], index: 3, kind: input, shape index: {}]   ;;  %s736_s4 = inlined_call_operand.vmem [shape: f32[1,32], index: 4, kind: input, shape index: {}]   ;;  %s737_s5 = inlined_call_operand.hbm [shape: bf16[32,32], index: 5, kind: output, shape index: {}]  }
   0x1   :  { %12 = vsyncpa [#allocation3 + $0x1], 0  ;;  %s608_s18 = smov 0   ;;  %s610_s19 = smov 0  }
   0x2   :  { %s612_s20 = smov 0   ;;  %s614_s21 = smov 0  }
   0x3 LB: > { %s629_s22 = sadd.s32 4294967295, %s573_s21   ;;  %s427_s23 = sadd.s32 4294967294, %s573_s21   ;;  %s573_s21 = sphi %s614_s21, %s743_s21   ;;  %s569_s20 = sphi %s612_s20, %s742_s20   ;;  %s565_s19 = sphi %s610_s19, %s741_s19   ;;  %s561_s18 = sphi %s608_s18, %s740_s18  }
   0x4   : > { %s633_s24 = sadd.s32 1, %s573_s21   ;;  %s135_s25 = sadd.s32 1, %s569_s20 }
   0x5   : > { %s132_s26 = ssub.s32 %s573_s21, %s633_s24  ;;  %p145_p0 = scmp.ne.s32.totalorder %s569_s20, %s565_s19 }
   0x6   : > { %p133_p1 = scmp.eq.s32.totalorder %s132_s26, 0  ;;  %p146_p2 = scmp.eq.s32.totalorder %s629_s22, 3 }
   0x7   : > { %p151_p3 = scmp.ne.s32.totalorder %s565_s19, %s561_s18  ;;  %p152_p4 = scmp.eq.s32.totalorder %s427_s23, 3 }
   0x8   : > { %s644_s27 = scalar_select %p133_p1, %s569_s20, %s135_s25  }
   0x9   : > { %p646_p5 = por %p146_p2, %p145_p0  ;;  %p650_p6 = por %p152_p4, %p151_p3 }
   0xa   : > { %p430_p7 = scmp.ge.s32.totalorder %s573_s21, 1  ;;  %p189_p8 = scmp.lt.s32.totalorder %s573_s21, 5 }
   0xc   : > { %p190_p9 = pnand %p430_p7, %p189_p8 }
   0xd   : > { %p216_p10 = scmp.lt.s32.totalorder (!%p190_p9), %s629_s22, 3  ;;  %vm222_vm0 = vcmask (!%p190_p9), 523264   ;;  %v503_v7 = vld [vmem:[%s733_s1] sm:$0xff] (!%p190_p9)   ;;  %v575_v8 = vmov (!%p190_p9), 0.0   ;;  %v504_v9 = vld [vmem:[%s733_s1 + $0x8] sm:$0xff] (!%p190_p9)   ;;  %vm576_vm1 = vmmov (!%p190_p9), 0  }
   0xe   : > { %193 = sbr.rel (%p190_p9) target bundleno = 880 (0x370), region = 40  ;;  %450 = vmatprep.subr.bf16.mxu0 (!%p190_p9), %v575_v8  ;;  %458 = vmatprep.mubr.msk.bf16.mxu0 (!%p190_p9), %vm576_vm1, %v575_v8  ;;  %v505_v10 = vld [vmem:[%s733_s1 + $0x10] sm:$0xff] (!%p190_p9)   ;;  %v506_v11 = vld [vmem:[%s733_s1 + $0x18] sm:$0xff] (!%p190_p9)   ;;  %v433_v18 = vld [vmem:[%s734_s2] ss:$0 sm:$0xff] (!%p190_p9)  ;;  %vm320_vm2 = vcmask (!%p190_p9), 261120  }
   0xf   : > { %451 = vmatpush3.bf16.msra.mxu0 (!%p190_p9), %v503_v7  ;;  %s213_s26 = sand.u32 (!%p190_p9), 1, %s565_s19   ;;  %v439_v34 = vld [vmem:[%s735_s3] ss:$0 sm:$0xff] (!%p190_p9)  ;;  %s442_s10 = sshll.u32 (!%p190_p9), %s629_s22, 6  ;;  %vm352_vm3 = vcmask (!%p190_p9), 257024  }
  0x10   : > { %452 = vmatprep.subr.bf16.mxu0 (!%p190_p9), %v575_v8  ;;  %v440_v36 = vld [vmem:[%s736_s4] ss:$0 sm:$0xff] (!%p190_p9)  ;;  %s690_s15 = scalar_lea.hbm (!%p190_p9), %s737_s5, %s442_s10  ;;  %s355_s16 = scalar_lea.sflag (!%p190_p9), [#allocation3], %s213_s26 }
  0x13   : > { %453 = vmatpush3.bf16.msra.mxu0 (!%p190_p9), %v504_v9 }
  0x14   : > { %454 = vmatprep.subr.bf16.mxu0 (!%p190_p9), %v575_v8 }
  0x15   : > { %s217_s30 = scalar_select %p216_p10, %s629_s22, 3 }
  0x16   : > { %s577_s22 = smov [#allocation2]  }
  0x17   : > { %s432_s6 = sshll.u32 %s217_s30, 3  ;;  %455 = vmatpush3.bf16.msra.mxu0 %v505_v10  ;;  %s431_s30 = sshll.u32 %s213_s26, 2 }
  0x18   : > { %s219_s9 = scalar_lea.vmem %s732_s0, %s432_s6  ;;  %456 = vmatprep.subr.bf16.mxu0 %v575_v8  ;;  %s215_s11 = scalar_lea.vmem [#allocation2], %s431_s30 }
  0x19   : > { %v221_v0 = vld [vmem:[%s219_s9] sm:$0xff]  ;;  %s368_s12 = sshll.u32 %s215_s11, 4  ;;  %s515_s23 = sshll.u32 %s577_s22, 4  ;;  %s692_s12 = int_to_ptr.vmem [resolvable:$true] %s368_s12  ;;  %s516_s23 = int_to_ptr.vmem [resolvable:$false] %s515_s23 }
  0x1a   : > { %v223_v1 = vsel %vm222_vm0, %v221_v0, 0.0  ;;  %s511_s17 = scalar_lea.vmem %s692_s12, 64  ;;  %s517_s25 = scalar_lea.vmem %s516_s23, 128 }
  0x1b   : > { %224 = vadd.xlane.f32.xlu0 %v223_v1  ;;  %457 = vmatpush3.bf16.msra.mxu0 %v506_v11  ;;  %p512_p11 = scmp.ne.s32.totalorder %s692_s12, %s511_s17  ;;  %p518_p0 = scmp.lt.s32.totalorder %s692_s12, %s516_s23 }
  0x1c   : > { %p519_p1 = scmp.lt.s32.totalorder %s517_s25, %s511_s17 }
  0x1d   : > { %p513_p12 = pnand %p512_p11, %p646_p5 }
  0x1e   : > { %p520_p2 = por %p519_p1, %p518_p0 }
  0x1f   : > { %p514_p13 = pneg %p513_p12 }
  0x21   : > { %p521_p3 = pnand %p520_p2, %p514_p13 }
  0xa8   : > { %v225_v2 = vpop.xlane.xlu0 %224 }
  0xa9   : > { %v227_v3 = vmul.f32 0.015625, %v225_v2 }
  0xab   : > { %v228_v4 = vsub.f32 %v221_v0, %v227_v3 }
  0xad   : > { %v229_v5 = vmul.f32 %v228_v4, %v228_v4 }
  0xaf   : > { %v230_v6 = vsel %vm222_vm0, %v229_v5, 0.0 }
  0xb0   : > { %231 = vadd.xlane.f32.xlu0 %v230_v6 }
 0x13d   : > { %v232_v12 = vpop.xlane.xlu0 %231 }
 0x13e   : > { %v233_v13 = vmul.f32 0.015625, %v232_v12 }
 0x140   : > { %v234_v14 = vadd.f32 1e-05, %v233_v13 }
 0x142   : > { %507 = vrsqrt.f32 %v234_v14 }
 0x14c   : > { %v508_v15 = vpop.eup %507 }
 0x14d   : > { %v236_v16 = vmul.f32 %v508_v15, %v228_v4 }
 0x14f   : > { %v237_v17 = vpack.c.bf16 %v236_v16, %v236_v16 }
 0x151   : > { %459 = vmatmul.mubr.msk.bf16.vlgmr.msra.gmra.mrb[0].mxu0 %vm222_vm0, %v237_v17 }
 0x224   : > { %v314_v19 = vpop.f32.mrb[0].mxu0 }
 0x225   : > { %v315_v20 = vadd.f32 %v433_v18, %v314_v19  ;;  %v460_v21 = vpop.f32.mrb[1].mxu0 }
 0x226   : > { %v317_v22 = vpop.f32.mrb[2].mxu0 }
 0x227   : > { %v461_v23 = vpop.f32.mrb[3].mxu0  ;;  %v321_v24 = vsel %vm320_vm2, %v315_v20, 0.0 }
 0x228   : > { %322 = vadd.xlane.f32.xlu1 %v321_v24 }
 0x2b5   : > { %v323_v25 = vpop.xlane.xlu1 %322 }
 0x2b6   : > { %v325_v26 = vmul.f32 0.03125, %v323_v25 }
 0x2b8   : > { %v326_v27 = vsub.f32 %v315_v20, %v325_v26 }
 0x2ba   : > { %v327_v28 = vmul.f32 %v326_v27, %v326_v27 }
 0x2bc   : > { %v328_v29 = vsel %vm320_vm2, %v327_v28, 0.0 }
 0x2bd   : > { %329 = vadd.xlane.f32.xlu1 %v328_v29 }
 0x34a   : > { %v330_v30 = vpop.xlane.xlu1 %329 }
 0x34b   : > { %v331_v31 = vmul.f32 0.03125, %v330_v30 }
 0x34d   : > { %v332_v32 = vadd.f32 1e-05, %v331_v31 }
 0x34f   : > { %509 = vrsqrt.f32 %v332_v32 }
 0x359   : > { %v510_v33 = vpop.eup %509 }
 0x35a   : > { %v334_v35 = vmul.f32 %v510_v33, %v326_v27 }
 0x35c   : > { %v342_v37 = vmul.f32 %v439_v34, %v334_v35 }
 0x35e   : > { %v350_v38 = vadd.f32 %v440_v36, %v342_v37 }
 0x360   : > { %v351_v39 = vpack.c.bf16 %v350_v38, %v350_v38 }
 0x362   : > { %353 = vst.msk [vmem:[%s215_s11] sm:$0xf] %vm352_vm3, %v351_v39 }
 0x363   : > { %524 = shalt.err (!%p521_p3)
}
 0x364   : > { %s525_s26 = scalar_lea.hbm %s690_s15, 64  ;;  %s529_s7 = scalar_lea.hbm %s737_s5, 256 }
 0x365   : > { %p526_p4 = scmp.ne.s32.totalorder %s690_s15, %s525_s26  ;;  %p530_p9 = scmp.lt.u32.totalorder %s690_s15, %s737_s5 }
 0x366   : > { %p531_p10 = scmp.lt.u32.totalorder %s529_s7, %s525_s26  ;;  %p533_p12 = scmp.lt.u32.totalorder %s525_s26, %s690_s15 }
 0x367   : > { %p527_p7 = pnand %p526_p4, %p646_p5 }
 0x368   : > { %p532_p11 = por %p531_p10, %p530_p9 }
 0x369   : > { %p528_p8 = pneg %p527_p7 }
 0x36a   : > { %p534_p13 = por %p533_p12, %p532_p11 }
 0x36c   : > { %p535_p0 = pnand %p534_p13, %p528_p8 }
 0x36e   : > { %538 = shalt.err (!%p535_p0)
}
 0x36f   : > { %462 = dma.vmem_to_hbm [thread:$0]  (%p646_p5), %s692_s12, 64, %s690_s15, %s355_s16  }
 0x370 PF: > { %p468_p1 = scmp.ge.s32.totalorder %s573_s21, 2  ;;  %s380_s10 = sand.u32 1, %s561_s18  }
 0x371   : > { %s381_s11 = scalar_lea.sflag [#allocation3], %s380_s10 }
 0x372   : > { %p465_p2 = pnand %p468_p1, %p650_p6 }
 0x374   : > { %556 = dma.done.wait (!%p465_p2), %s381_s11, 64  }
 0x375   : > { %558 = vsyncadd (!%p465_p2), %s381_s11, 4294967232  ;;  %p15_p3 = scmp.ge.s32.totalorder %s633_s24, 6   ;;  %s740_s18 = smov %s565_s19 }
 0x376   : > { %s741_s19 = smov %s569_s20  ;;  %s742_s20 = smov %s644_s27 }
 0x377   : > { %s743_s21 = smov %s633_s24  ;;  %17 = sbr.rel (!%p15_p3) target bundleno = 3 (0x3), region = 75 }
 0x37e   :  { %386 = vsyncpa [#allocation3], 1 }
 0x37f   :  { %388 = vsyncpa [#allocation3 + $0x1], 1 }

</bundles_post_ra>
